<compile_context>
chip_gen: v6e
topology: v6e:2x2x1
jax: 0.10.0
libtpu: 0.0.40
codegen_flags: <defaults>
</compile_context>

<pallas_src>
import jax
import jax.numpy as jnp
from jax import lax
from jax.experimental import pallas as pl
from jax.experimental.pallas import tpu as pltpu


def _player_forward_kernel(w_ref, o_ref):
    # w_ref/o_ref: full (R, 2) arrays resident in VMEM (gridless call).
    w0 = w_ref[:, 0:1]  # (R, 1)
    w1 = w_ref[:, 1:2]  # (R, 1)
    if w0.dtype != jnp.float32:  # upcast only when the parameter is low precision
        w0 = w0.astype(jnp.float32)
        w1 = w1.astype(jnp.float32)

    # softmax_0 - 0.5 = 0.5 * tanh((w0 - w1) / 2); softmax_1 - 0.5 = -(that).
    t = 0.5 * jnp.tanh(0.5 * (w0 - w1))  # (R, 1)

    col = lax.broadcasted_iota(jnp.int32, o_ref.shape, dimension=1)  # (R, 2)
    out = jnp.where(col == 0, t, -t)  # broadcast (R,1) -> (R,2)
    o_ref[...] = out.astype(o_ref.dtype)


def player_forward(linear: jax.Array) -> jax.Array:
    """Compute F.softmax(linear, dim=1) - 0.5 with a Pallas TPU kernel."""
    assert linear.ndim == 2 and linear.shape[1] == 2, "Player has 2 actions"
    R, C = linear.shape
    return pl.pallas_call(
        _player_forward_kernel,
        out_shape=jax.ShapeDtypeStruct((R, C), linear.dtype),
        in_specs=[pl.BlockSpec(memory_space=pltpu.MemorySpace.VMEM)],
        out_specs=pl.BlockSpec(memory_space=pltpu.MemorySpace.VMEM),
    )(linear)


if __name__ == "__main__":
    # Deterministic parameter init mimicking torch.rand(1, 2) (uniform [0, 1)).
    key = jax.random.PRNGKey(0)
    linear = jax.random.uniform(key, (1, 2), dtype=jnp.float32)

    out = player_forward(linear)
    jax.block_until_ready(out)

    # Reference check in plain JAX.
    ref = jax.nn.softmax(linear, axis=1) - 0.5
    assert out.shape == (1, 2) and out.dtype == jnp.float32
    assert jnp.allclose(out, ref, atol=1e-5, rtol=1e-5), (out, ref)

    print("KERNEL_OK")
</pallas_src>

<mosaic_0001>
module attributes {stable_mosaic.version = 11 : i64} {
  func.func @_player_forward_kernel(%arg0: memref<1x2xf32, #tpu.memory_space<vmem>>, %arg1: memref<1x2xf32, #tpu.memory_space<vmem>>) attributes {dimension_semantics = [], scalar_prefetch = 0 : i64, scratch_operands = 0 : i64, tpu.core_type = #tpu.core_type<tc>} {
    %c0 = arith.constant 0 : index
    %c0_0 = arith.constant 0 : index
    %0 = vector.load %arg0[%c0, %c0_0] : memref<1x2xf32, #tpu.memory_space<vmem>>, vector<1x1xf32>
    %c0_1 = arith.constant 0 : index
    %c1 = arith.constant 1 : index
    %1 = vector.load %arg0[%c0_1, %c1] : memref<1x2xf32, #tpu.memory_space<vmem>>, vector<1x1xf32>
    %2 = arith.subf %0, %1 : vector<1x1xf32>
    %cst = arith.constant 5.000000e-01 : f32
    %3 = vector.broadcast %cst : f32 to vector<1x1xf32>
    %4 = arith.mulf %3, %2 : vector<1x1xf32>
    %5 = math.tanh %4 : vector<1x1xf32>
    %cst_2 = arith.constant 5.000000e-01 : f32
    %6 = vector.broadcast %cst_2 : f32 to vector<1x1xf32>
    %7 = arith.mulf %6, %5 : vector<1x1xf32>
    %8 = tpu.iota {dimensions = array<i32: 1>} : vector<1x2xi32>
    %c0_i32 = arith.constant 0 : i32
    %9 = vector.broadcast %c0_i32 : i32 to vector<1x2xi32>
    %10 = arith.cmpi eq, %8, %9 : vector<1x2xi32>
    %cst_3 = arith.constant 0.000000e+00 : f32
    %11 = vector.broadcast %cst_3 : f32 to vector<1x1xf32>
    %12 = arith.subf %11, %7 : vector<1x1xf32>
    %13 = vector.shape_cast %7 : vector<1x1xf32> to vector<1x1xf32>
    %14 = vector.broadcast %13 : vector<1x1xf32> to vector<1x2xf32>
    %15 = vector.shape_cast %12 : vector<1x1xf32> to vector<1x1xf32>
    %16 = vector.broadcast %15 : vector<1x1xf32> to vector<1x2xf32>
    %17 = arith.select %10, %14, %16 : vector<1x2xi1>, vector<1x2xf32>
    %c0_4 = arith.constant 0 : index
    %c0_5 = arith.constant 0 : index
    %18 = vector.load %arg1[%c0_4, %c0_5] : memref<1x2xf32, #tpu.memory_space<vmem>>, vector<1x2xf32>
    tpu.vector_store %arg1[%c0_4, %c0_5], %17 {strides = array<i32>} : memref<1x2xf32, #tpu.memory_space<vmem>>, vector<1x2xf32>,
    return
  }
}

</mosaic_0001>

<bundles_post_ra>
// kernel: tpu_custom_call.1
= control target key start
LH: loop header
LB: loop body
LE: loop exit
PB: predicated region body
PF: predicated region fallthrough
CT: control target
= control target key end

     0   :  { %6 = vsyncpa [#allocation3], 0  ;;  %s142_s0 = inlined_call_operand.hbm [shape: f32[1,2], index: 0, kind: input, shape index: {}]   ;;  %s143_s1 = inlined_call_operand.hbm [shape: f32[1,2], index: 1, kind: output, shape index: {}]  }
   0x1   :  { %7 = vsyncpa [#allocation4], 0  ;;  %s122_s6 = smov [#allocation2]  }
   0x2   :  { %s14_s7 = sshll.u32 %s122_s6, 4  ;;  %s15_s7 = int_to_ptr.vmem [resolvable:$true] %s14_s7 }
   0x3   :  { %s86_s8 = scalar_lea.vmem %s15_s7, 16  ;;  %s90_s9 = scalar_lea.vmem %s15_s7, 32 }
   0x4   :  { %p87_p0 = scmp.ne.s32.totalorder %s15_s7, %s86_s8  ;;  %p91_p1 = scmp.lt.s32.totalorder %s15_s7, %s15_s7 }
   0x5   :  { %p92_p2 = scmp.lt.s32.totalorder %s90_s9, %s86_s8 }
   0x7   :  { %p93_p3 = por %p92_p2, %p91_p1 }
   0x9   :  { %p94_p4 = pnand %p93_p3, %p87_p0 }
   0xb   :  { %97 = shalt.err (!%p94_p4)
}
   0xc   :  { %17 = dma.hbm_to_vmem [thread:$0]  %s142_s0, 16, %s15_s7, [#allocation3]  }
   0xd   :  { %118 = dma.done.wait [#allocation3], 16  }
   0xe   :  { %119 = vsyncadd [#allocation3], 4294967280  ;;  %v123_v0 = vmov 0   ;;  %v21_v1 = vld [vmem:[#allocation2] sm:$0x1]  ;;  %s124_s12 = smov 127   ;;  %v30_v8 = vlaneseq }
   0xf   :  { %74 = vset.pattern.permute.xlu0 %v123_v0  ;;  %75 = vset.pattern.permute.xlu1 %v123_v0  ;;  %s125_s0 = smov [#allocation5]   ;;  %vm53_vm1 = vcmask 8192  }
  0x10   :  { %23 = vrot.lane.b32.xlu0 %v21_v1, %s124_s12  ;;  %v40_v9 = vshrl.u32 %v30_v8, 7  ;;  %v31_v10 = vand.u32 127, %v30_v8  ;;  %s61_s13 = sshll.u32 %s125_s0, 4  ;;  %s62_s13 = int_to_ptr.vmem [resolvable:$true] %s61_s13 }
  0x11   :  { %s98_s14 = scalar_lea.vmem %s62_s13, 16  ;;  %s102_s15 = scalar_lea.vmem %s62_s13, 32 }
  0x12   :  { %v41_v11 = vsub.s32 0, %v40_v9  ;;  %vm32_vm0 = vcmp.eq.s32.totalorder %v31_v10, 0  ;;  %p99_p5 = scmp.ne.s32.totalorder %s62_s13, %s98_s14  ;;  %p103_p6 = scmp.lt.s32.totalorder %s62_s13, %s62_s13 }
  0x13   :  { %p104_p7 = scmp.lt.s32.totalorder %s102_s15, %s98_s14 }
  0x15   :  { %p105_p8 = por %p104_p7, %p103_p6 }
  0x17   :  { %p106_p9 = pnand %p105_p8, %p99_p5 }
  0x82   :  { %v24_v2 = vpop.permute.xlu0 %23 }
  0x83   :  { %v26_v3 = vsub.f32 %v21_v1, %v24_v2 }
  0x85   :  { %v27_v4 = vmul.f32 0.5, %v26_v3 }
  0x87   :  { %76 = vtanh.f32 %v27_v4 }
  0x94   :  { %v77_v5 = vpop.eup %76 }
  0x95   :  { %v29_v6 = vmul.f32 0.5, %v77_v5 }
  0x97   :  { %36 = vperm.xlu0 %74, %v29_v6   ;;  %v33_v7 = vsub.f32 0.0, %v29_v6 }
  0x99   :  { %45 = vperm.xlu1 %75, %v33_v7  }
 0x112   :  { %v37_v12 = vpop.permute.xlu0 %36 }
 0x113   :  { %v42_v14 = vrot.slane %v37_v12, %v41_v11 }
 0x114   :  { %v46_v13 = vpop.permute.xlu1 %45 }
 0x115   :  { %v51_v15 = vrot.slane %v46_v13, %v41_v11 }
 0x117   :  { %v52_v16 = vsel %vm32_vm0, %v42_v14, %v51_v15 }
 0x118   :  { %54 = vst.msk [vmem:[#allocation5] sm:$0x1] %vm53_vm1, %v52_v16 }
 0x119   :  { %109 = shalt.err (!%p106_p9)
}
 0x11a   :  { %64 = dma.vmem_to_hbm [thread:$0]  %s62_s13, 16, %s143_s1, [#allocation4]  }
 0x11b   :  { %120 = dma.done.wait [#allocation4], 16  }
 0x11c   :  { %121 = vsyncadd [#allocation4], 4294967280 }
 0x11d   :  { %68 = vsyncpa [#allocation3], 1 }
 0x11e   :  { %69 = vsyncpa [#allocation4], 1 }

</bundles_post_ra>
